<compile_context>
chip_gen: v7x
topology: tpu7x:2x2x1
jax: 0.10.0
libtpu: 0.0.40
codegen_flags: <defaults>
</compile_context>

<pallas_src>
import functools

import jax
import jax.numpy as jnp
import numpy as np
from jax.experimental import pallas as pl
from jax.experimental.pallas import tpu as pltpu

_SUBL = 8                 # f32 sublanes per vreg
_LANES = 128              # lanes per vreg
_INNER_ROWS = 64          # rows per inner-loop tile (32 KiB live -> no spill)
_MAX_CHUNK_ROWS = 4096    # rows per grid step: 2 MiB block, 4 MiB double-buffered
_SMALL_N_FAST_PATH = 512  # diagrams with <= this many bars skip Pallas entirely


def _round_up(x, m):
    return ((x + m - 1) // m) * m


def _squared_barcode_lengths_kernel(x_ref, out_ref, *, issublevel, valid_rows,
                                    chunk_rows, inner_rows, needs_row_mask):
    # x_ref:   (chunk_rows, 128) f32, lanes hold interleaved (birth, death) pairs
    # out_ref: (1, 8, 128) f32 per-chunk partial sums (reduced in the wrapper)
    num_inner = chunk_rows // inner_rows

    # Lane-parity mask hoisted out of the loop (odd lanes hold x[2k+1] - x[2k]
    # after the +1 lane roll).  Materialised once: JAX does not CSE broadcasts.
    lane_ids = jax.lax.broadcasted_iota(jnp.int32, (1, _LANES), 1)
    is_len_lane = jnp.broadcast_to((lane_ids & 1) == 1, (inner_rows, _LANES))

    if needs_row_mask:
        # Only the last (partial) block has rows past the array end; their VMEM
        # contents are undefined, so mask by global row index.
        local_rows = jax.lax.broadcasted_iota(jnp.int32, (inner_rows, 1), 0)
        block_row0 = pl.program_id(0) * chunk_rows

    def body(i, acc):
        r0 = pl.multiple_of(i * inner_rows, inner_rows)
        x = x_ref[pl.ds(r0, inner_rows), :]                  # (inner_rows, 128)
        rolled = pltpu.roll(x, shift=1, axis=1)              # XLU: x[..., j-1]
        # odd lanes of (x - rolled) == death - birth == col1 - col0
        lengths = (x - rolled) if issublevel else (rolled - x)
        # one compare drops +inf bars and NaN padding, keeps -inf (like torch);
        # the filter is on lengths (before squaring).
        keep = is_len_lane & (lengths < jnp.inf)
        if needs_row_mask:
            keep = keep & ((local_rows + (block_row0 + r0)) < valid_rows)
        lsq = jnp.where(keep, lengths * lengths, 0.0)
        # layout-free reshape (groups whole vregs) + elementwise partial sum
        return acc + jnp.sum(lsq.reshape(inner_rows // _SUBL, _SUBL, _LANES),
                             axis=0)

    acc = jax.lax.fori_loop(0, num_inner, body,
                            jnp.zeros((_SUBL, _LANES), jnp.float32),
                            unroll=min(8, num_inner))
    out_ref[...] = acc.reshape(1, _SUBL, _LANES)


@functools.partial(
    jax.jit,
    static_argnames=("issublevel", "max_chunk_rows", "small_n_fast_path"))
def _squared_barcode_lengths_impl(dgm, *, issublevel, max_chunk_rows,
                                  small_n_fast_path):
    n = dgm.shape[0]

    # Small-N fast path: a Pallas launch (plus pad/reshape) is pure dispatch
    # overhead for a few hundred bars - compute directly in XLA.
    if n <= small_n_fast_path:
        col0, col1 = dgm[:, 0], dgm[:, 1]
        lengths = (col1 - col0) if issublevel else (col0 - col1)
        return jnp.sum(jnp.where(lengths < jnp.inf, lengths * lengths, 0.0))

    # Row-major flatten keeps (birth, death) interleaved; zero-pad (zero-length
    # bars contribute 0) only up to a 64-row tile boundary.
    flat = dgm.reshape(-1)                                   # (2N,)
    rows = _round_up(pl.cdiv(2 * n, _LANES), _INNER_ROWS)
    flat = jnp.pad(flat, (0, rows * _LANES - 2 * n))
    x = flat.reshape(rows, _LANES)

    chunk_rows = min(rows, max(_INNER_ROWS,
                               (max_chunk_rows // _INNER_ROWS) * _INNER_ROWS))
    num_chunks = pl.cdiv(rows, chunk_rows)
    needs_row_mask = (num_chunks * chunk_rows) != rows       # ragged last block

    kernel = functools.partial(
        _squared_barcode_lengths_kernel,
        issublevel=issublevel, valid_rows=rows, chunk_rows=chunk_rows,
        inner_rows=_INNER_ROWS, needs_row_mask=needs_row_mask)

    partial_sums = pl.pallas_call(
        kernel,
        out_shape=jax.ShapeDtypeStruct((num_chunks, _SUBL, _LANES), jnp.float32),
        grid=(num_chunks,),
        in_specs=[pl.BlockSpec((chunk_rows, _LANES), lambda i: (i, 0))],
        out_specs=pl.BlockSpec((1, _SUBL, _LANES), lambda i: (i, 0, 0)),
        compiler_params=pltpu.CompilerParams(
            dimension_semantics=("parallel",)),   # megacore-shardable on v7x
    )(x)

    # tiny final reduction of the lane-dense per-chunk partials
    return jnp.sum(partial_sums)


def squared_barcode_lengths(dgms, issublevel, dim=0, *,
                            max_chunk_rows=_MAX_CHUNK_ROWS,
                            small_n_fast_path=_SMALL_N_FAST_PATH):
    """JAX/Pallas forward pass of SquaredBarcodeLengths(dim).forward((dgms, issublevel))."""
    dgm = jnp.asarray(dgms[dim], dtype=jnp.float32)
    return _squared_barcode_lengths_impl(
        dgm, issublevel=bool(issublevel),
        max_chunk_rows=int(max_chunk_rows),
        small_n_fast_path=int(small_n_fast_path))


def _numpy_reference(dgm, issublevel):
    d = np.asarray(dgm, dtype=np.float64)
    if issublevel:
        start, end = d[:, 0], d[:, 1]
    else:
        start, end = d[:, 1], d[:, 0]
    lengths = end - start
    lengths[lengths == np.inf] = 0.0
    lengths[lengths != lengths] = 0.0
    return np.sum(lengths ** 2)


if __name__ == "__main__":
    key = jax.random.PRNGKey(0)
    k0, k1, k2, k3 = jax.random.split(key, 4)

    # dim-0 diagram: 12000 bars (Pallas path), one infinite bar, two NaN rows
    n_big = 12000
    births0 = jax.random.uniform(k0, (n_big,), dtype=jnp.float32)
    deaths0 = births0 + jax.random.uniform(k1, (n_big,), dtype=jnp.float32)
    dgm0 = jnp.stack([births0, deaths0], axis=1)
    dgm0 = dgm0.at[0, 1].set(jnp.inf)            # infinite bar
    dgm0 = dgm0.at[n_big - 1, :].set(jnp.nan)    # NaN padding rows
    dgm0 = dgm0.at[n_big // 2, :].set(jnp.nan)

    # dim-1 diagram: 8 bars (small-N fast path), with an inf bar and a NaN row
    births1 = jax.random.uniform(k2, (8,), dtype=jnp.float32)
    deaths1 = births1 + jax.random.uniform(k3, (8,), dtype=jnp.float32)
    dgm1 = jnp.stack([births1, deaths1], axis=1)
    dgm1 = dgm1.at[0, 1].set(jnp.inf)
    dgm1 = dgm1.at[7, :].set(jnp.nan)

    dgms = (dgm0, dgm1)
    failures = []

    def check(result, ref, tag):
        if not np.allclose(float(result), ref, rtol=1e-5, atol=1e-5):
            failures.append((tag, float(result), ref))

    for dim, dgm in ((0, dgm0), (1, dgm1)):
        for issublevel in (True, False):
            res = jax.block_until_ready(
                squared_barcode_lengths(dgms, issublevel, dim=dim))
            check(res, _numpy_reference(dgm, issublevel),
                  f"dim={dim} sub={issublevel}")

    # Force a multi-chunk grid with a ragged (row-masked) last block + parallel
    # per-chunk partial outputs on the big diagram.
    for issublevel in (True, False):
        res = jax.block_until_ready(
            squared_barcode_lengths(dgms, issublevel, dim=0, max_chunk_rows=128))
        check(res, _numpy_reference(dgm0, issublevel),
              f"multichunk sub={issublevel}")

    for f in failures:
        print("MISMATCH", *f)
    assert not failures
    print("KERNEL_OK")
</pallas_src>

<mosaic_0001>
module attributes {stable_mosaic.version = 11 : i64} {
  func.func @_squared_barcode_lengths_kernel(%arg0: i32, %arg1: memref<192x128xf32, #tpu.memory_space<vmem>>, %arg2: memref<1x8x128xf32, #tpu.memory_space<vmem>>) attributes {dimension_semantics = [#tpu.dimension_semantics<parallel>], iteration_bounds = array<i64: 1>, scalar_prefetch = 0 : i64, scratch_operands = 0 : i64, tpu.core_type = #tpu.core_type<tc>, window_params = [{transform_indices = @transform_0, window_bounds = array<i64: 192, 128>}, {transform_indices = @transform_1, window_bounds = array<i64: 1, 8, 128>}]} {
    %0 = tpu.iota {dimensions = array<i32: 1>} : vector<1x128xi32>
    %c1_i32 = arith.constant 1 : i32
    %1 = vector.broadcast %c1_i32 : i32 to vector<1x128xi32>
    %2 = arith.andi %0, %1 : vector<1x128xi32>
    %c1_i32_0 = arith.constant 1 : i32
    %3 = vector.broadcast %c1_i32_0 : i32 to vector<1x128xi32>
    %4 = arith.cmpi eq, %2, %3 : vector<1x128xi32>
    %5 = vector.shape_cast %4 : vector<1x128xi1> to vector<1x128xi1>
    %6 = vector.broadcast %5 : vector<1x128xi1> to vector<64x128xi1>
    %cst = arith.constant 0.000000e+00 : f32
    %7 = vector.broadcast %cst : f32 to vector<8x128xf32>
    %c0_i32 = arith.constant 0 : i32
    %c64_i32 = arith.constant 64 : i32
    %8 = arith.muli %c0_i32, %c64_i32 : i32
    %9 = tpu.assume_multiple %8, 64 : i32
    %10 = arith.index_cast %9 : i32 to index
    %c0 = arith.constant 0 : index
    %11 = vector.load %arg1[%10, %c0] : memref<192x128xf32, #tpu.memory_space<vmem>>, vector<64x128xf32>
    %c1_i32_1 = arith.constant 1 : i32
    %12 = tpu.dynamic_rotate %11 by %c1_i32_1 dim 1 : vector<64x128xf32>, i32 -> vector<64x128xf32>
    %13 = arith.subf %11, %12 : vector<64x128xf32>
    %cst_2 = arith.constant 0x7F800000 : f32
    %14 = vector.broadcast %cst_2 : f32 to vector<64x128xf32>
    %15 = arith.cmpf olt, %13, %14 : vector<64x128xf32>
    %16 = arith.andi %6, %15 : vector<64x128xi1>
    %17 = arith.mulf %13, %13 : vector<64x128xf32>
    %cst_3 = arith.constant 0.000000e+00 : f32
    %18 = vector.broadcast %cst_3 : f32 to vector<64x128xf32>
    %19 = arith.select %16, %17, %18 : vector<64x128xi1>, vector<64x128xf32>
    %20 = vector.shape_cast %19 : vector<64x128xf32> to vector<8x8x128xf32>
    %cst_4 = arith.constant dense<0.000000e+00> : vector<8x128xf32>
    %21 = vector.multi_reduction <add>, %20, %cst_4 [0] : vector<8x8x128xf32> to vector<8x128xf32>
    %22 = arith.addf %7, %21 : vector<8x128xf32>
    %c1_i32_5 = arith.constant 1 : i32
    %c64_i32_6 = arith.constant 64 : i32
    %23 = arith.muli %c1_i32_5, %c64_i32_6 : i32
    %24 = tpu.assume_multiple %23, 64 : i32
    %25 = arith.index_cast %24 : i32 to index
    %c0_7 = arith.constant 0 : index
    %26 = vector.load %arg1[%25, %c0_7] : memref<192x128xf32, #tpu.memory_space<vmem>>, vector<64x128xf32>
    %c1_i32_8 = arith.constant 1 : i32
    %27 = tpu.dynamic_rotate %26 by %c1_i32_8 dim 1 : vector<64x128xf32>, i32 -> vector<64x128xf32>
    %28 = arith.subf %26, %27 : vector<64x128xf32>
    %cst_9 = arith.constant 0x7F800000 : f32
    %29 = vector.broadcast %cst_9 : f32 to vector<64x128xf32>
    %30 = arith.cmpf olt, %28, %29 : vector<64x128xf32>
    %31 = arith.andi %6, %30 : vector<64x128xi1>
    %32 = arith.mulf %28, %28 : vector<64x128xf32>
    %cst_10 = arith.constant 0.000000e+00 : f32
    %33 = vector.broadcast %cst_10 : f32 to vector<64x128xf32>
    %34 = arith.select %31, %32, %33 : vector<64x128xi1>, vector<64x128xf32>
    %35 = vector.shape_cast %34 : vector<64x128xf32> to vector<8x8x128xf32>
    %cst_11 = arith.constant dense<0.000000e+00> : vector<8x128xf32>
    %36 = vector.multi_reduction <add>, %35, %cst_11 [0] : vector<8x8x128xf32> to vector<8x128xf32>
    %37 = arith.addf %22, %36 : vector<8x128xf32>
    %c2_i32 = arith.constant 2 : i32
    %c64_i32_12 = arith.constant 64 : i32
    %38 = arith.muli %c2_i32, %c64_i32_12 : i32
    %39 = tpu.assume_multiple %38, 64 : i32
    %40 = arith.index_cast %39 : i32 to index
    %c0_13 = arith.constant 0 : index
    %41 = vector.load %arg1[%40, %c0_13] : memref<192x128xf32, #tpu.memory_space<vmem>>, vector<64x128xf32>
    %c1_i32_14 = arith.constant 1 : i32
    %42 = tpu.dynamic_rotate %41 by %c1_i32_14 dim 1 : vector<64x128xf32>, i32 -> vector<64x128xf32>
    %43 = arith.subf %41, %42 : vector<64x128xf32>
    %cst_15 = arith.constant 0x7F800000 : f32
    %44 = vector.broadcast %cst_15 : f32 to vector<64x128xf32>
    %45 = arith.cmpf olt, %43, %44 : vector<64x128xf32>
    %46 = arith.andi %6, %45 : vector<64x128xi1>
    %47 = arith.mulf %43, %43 : vector<64x128xf32>
    %cst_16 = arith.constant 0.000000e+00 : f32
    %48 = vector.broadcast %cst_16 : f32 to vector<64x128xf32>
    %49 = arith.select %46, %47, %48 : vector<64x128xi1>, vector<64x128xf32>
    %50 = vector.shape_cast %49 : vector<64x128xf32> to vector<8x8x128xf32>
    %cst_17 = arith.constant dense<0.000000e+00> : vector<8x128xf32>
    %51 = vector.multi_reduction <add>, %50, %cst_17 [0] : vector<8x8x128xf32> to vector<8x128xf32>
    %52 = arith.addf %37, %51 : vector<8x128xf32>
    %c3_i32 = arith.constant 3 : i32
    %53 = vector.shape_cast %52 : vector<8x128xf32> to vector<1x8x128xf32>
    %c0_18 = arith.constant 0 : index
    %c0_19 = arith.constant 0 : index
    %c0_20 = arith.constant 0 : index
    %54 = vector.load %arg2[%c0_18, %c0_19, %c0_20] : memref<1x8x128xf32, #tpu.memory_space<vmem>>, vector<1x8x128xf32>
    tpu.vector_store %arg2[%c0_18, %c0_19, %c0_20], %53 {strides = array<i32>} : memref<1x8x128xf32, #tpu.memory_space<vmem>>, vector<1x8x128xf32>,
    return
  }
  func.func @transform_0(%arg0: i32) -> (i32, i32) {
    %c0_i32 = arith.constant 0 : i32
    %c0_i32_0 = arith.constant 0 : i32
    return %arg0, %c0_i32 : i32, i32
  }
  func.func @transform_1(%arg0: i32) -> (i32, i32, i32) {
    %c0_i32 = arith.constant 0 : i32
    %c0_i32_0 = arith.constant 0 : i32
    %c0_i32_1 = arith.constant 0 : i32
    return %arg0, %c0_i32, %c0_i32_0 : i32, i32, i32
  }
}

</mosaic_0001>

<bundles_post_ra>
// kernel: _squared_barcode_lengths_impl.1
= control target key start
LH: loop header
LB: loop body
LE: loop exit
PB: predicated region body
PF: predicated region fallthrough
CT: control target
= control target key end

     0   :  { %s254_s10 = smov 1   ;;  %v8_v30 = vlaneseq  ;;  %s626_s0 = inlined_call_operand.vmem [shape: f32[192,128], index: 0, kind: input, shape index: {}]   ;;  %s627_s1 = inlined_call_operand.vmem [shape: f32[1,8,128], index: 1, kind: output, shape index: {}]  }
   0x1   :  { %v237_v0 = vld [vmem:[%s626_s0 + $0x40] sm:$0xff]  ;;  %v238_v2 = vld [vmem:[%s626_s0 + $0x48] sm:$0xff]  ;;  %v239_v4 = vld [vmem:[%s626_s0 + $0x50] sm:$0xff] }
   0x2   :  { %v271_v1 = vld [vmem:[%s626_s0] sm:$0xff]  ;;  %95 = vrot.lane.b32.xlu1 %v237_v0, %s254_s10  ;;  %v15_v3 = vld [vmem:[%s626_s0 + $0x8] sm:$0xff]  ;;  %v16_v5 = vld [vmem:[%s626_s0 + $0x10] sm:$0xff]  ;;  %v9_v33 = vand.u32 127, %v8_v30 }
   0x3   :  { %22 = vrot.lane.b32.xlu0 %v271_v1, %s254_s10  ;;  %v246_v6 = vld [vmem:[%s626_s0 + $0x88] sm:$0xff]  ;;  %v298_v7 = vld [vmem:[%s626_s0 + $0x80] sm:$0xff]  ;;  %v306_v8 = vld [vmem:[%s626_s0 + $0x58] sm:$0xff] }
   0x4   :  { %v311_v9 = vld [vmem:[%s626_s0 + $0x18] sm:$0xff]  ;;  %v320_v10 = vld [vmem:[%s626_s0 + $0x20] sm:$0xff]  ;;  %v325_v11 = vld [vmem:[%s626_s0 + $0x90] sm:$0xff]  ;;  %v10_v38 = vand.u32 1, %v9_v33 }
   0x5   :  { %v334_v12 = vld [vmem:[%s626_s0 + $0x98] sm:$0xff]  ;;  %v339_v13 = vld [vmem:[%s626_s0 + $0x60] sm:$0xff]  ;;  %v348_v14 = vld [vmem:[%s626_s0 + $0x68] sm:$0xff] }
   0x6   :  { %97 = vrot.lane.b32.xlu1 %v238_v2, %s254_s10  ;;  %v353_v15 = vld [vmem:[%s626_s0 + $0x28] sm:$0xff]  ;;  %v362_v16 = vld [vmem:[%s626_s0 + $0x30] sm:$0xff]  ;;  %v367_v17 = vld [vmem:[%s626_s0 + $0xa0] sm:$0xff]  ;;  %vm416_vm2 = vcmp.eq.s32.totalorder %v10_v38, 1 }
   0x7   :  { %24 = vrot.lane.b32.xlu0 %v15_v3, %s254_s10  ;;  %v376_v18 = vld [vmem:[%s626_s0 + $0xa8] sm:$0xff]  ;;  %v381_v19 = vld [vmem:[%s626_s0 + $0x70] sm:$0xff]  ;;  %v390_v20 = vld [vmem:[%s626_s0 + $0x78] sm:$0xff] }
   0x8   :  { %v395_v21 = vld [vmem:[%s626_s0 + $0x38] sm:$0xff]  ;;  %v404_v22 = vld [vmem:[%s626_s0 + $0xb0] sm:$0xff] }
   0x9   :  { %v409_v23 = vld [vmem:[%s626_s0 + $0xb8] sm:$0xff] }
   0xa   :  { %99 = vrot.lane.b32.xlu1 %v239_v4, %s254_s10 }
   0xb   :  { %26 = vrot.lane.b32.xlu0 %v16_v5, %s254_s10 }
   0xe   :  { %170 = vrot.lane.b32.xlu1 %v246_v6, %s254_s10 }
   0xf   :  { %168 = vrot.lane.b32.xlu0 %v298_v7, %s254_s10 }
  0x12   :  { %101 = vrot.lane.b32.xlu1 %v306_v8, %s254_s10 }
  0x13   :  { %28 = vrot.lane.b32.xlu0 %v311_v9, %s254_s10 }
  0x16   :  { %30 = vrot.lane.b32.xlu1 %v320_v10, %s254_s10 }
  0x17   :  { %172 = vrot.lane.b32.xlu0 %v325_v11, %s254_s10 }
  0x1a   :  { %174 = vrot.lane.b32.xlu1 %v334_v12, %s254_s10 }
  0x1b   :  { %103 = vrot.lane.b32.xlu0 %v339_v13, %s254_s10 }
  0x1e   :  { %105 = vrot.lane.b32.xlu1 %v348_v14, %s254_s10 }
  0x1f   :  { %32 = vrot.lane.b32.xlu0 %v353_v15, %s254_s10 }
  0x22   :  { %34 = vrot.lane.b32.xlu1 %v362_v16, %s254_s10 }
  0x23   :  { %176 = vrot.lane.b32.xlu0 %v367_v17, %s254_s10 }
  0x26   :  { %178 = vrot.lane.b32.xlu1 %v376_v18, %s254_s10 }
  0x27   :  { %107 = vrot.lane.b32.xlu0 %v381_v19, %s254_s10 }
  0x2a   :  { %109 = vrot.lane.b32.xlu1 %v390_v20, %s254_s10 }
  0x2b   :  { %36 = vrot.lane.b32.xlu0 %v395_v21, %s254_s10 }
  0x2e   :  { %182 = vrot.lane.b32.xlu1 %v409_v23, %s254_s10 }
  0x2f   :  { %180 = vrot.lane.b32.xlu0 %v404_v22, %s254_s10 }
  0x74   :  { %v96_v24 = vpop.permute.xlu1 %95 }
  0x75   :  { %v23_v25 = vpop.permute.xlu0 %22  ;;  %v111_v34 = vsub.f32 %v237_v0, %v96_v24 }
  0x76   :  { %v38_v39 = vsub.f32 %v271_v1, %v23_v25 }
  0x77   :  { %vm119_vm0 = vcmp.lt.f32.partialorder %v111_v34, inf  ;;  %v135_v48 = vmul.f32 %v111_v34, %v111_v34 }
  0x78   :  { %v98_v26 = vpop.permute.xlu1 %97  ;;  %vm46_vm3 = vcmp.lt.f32.partialorder %v38_v39, inf  ;;  %vm422_vm4 = vmand %vm416_vm2, %vm119_vm0  ;;  %v62_v57 = vmul.f32 %v38_v39, %v38_v39 }
  0x79   :  { %v25_v27 = vpop.permute.xlu0 %24  ;;  %v112_v35 = vsub.f32 %v238_v2, %v98_v26  ;;  %vm436_vm8 = vmand %vm416_vm2, %vm46_vm3  ;;  %v143_v61 = vsel %vm422_vm4, %v135_v48, 0.0 }
  0x7a   :  { %v39_v40 = vsub.f32 %v15_v3, %v25_v27 }
  0x7b   :  { %vm120_vm1 = vcmp.lt.f32.partialorder %v112_v35, inf  ;;  %v136_v49 = vmul.f32 %v112_v35, %v112_v35 }
  0x7c   :  { %v100_v28 = vpop.permute.xlu1 %99  ;;  %vm47_vm5 = vcmp.lt.f32.partialorder %v39_v40, inf  ;;  %vm429_vm6 = vmand %vm416_vm2, %vm120_vm1  ;;  %v63_v59 = vmul.f32 %v39_v40, %v39_v40 }
  0x7d   :  { %v27_v29 = vpop.permute.xlu0 %26  ;;  %v113_v41 = vsub.f32 %v239_v4, %v100_v28  ;;  %vm443_vm10 = vmand %vm416_vm2, %vm47_vm5  ;;  %v144_v62 = vsel %vm429_vm6, %v136_v49, 0.0 }
  0x7e   :  { %v40_v42 = vsub.f32 %v16_v5, %v27_v29  ;;  %v71_v24 = vsel %vm443_vm10, %v63_v59, 0.0  ;;  %v151_v26 = vadd.f32 %v144_v62, %v143_v61 }
  0x7f   :  { %vm121_vm7 = vcmp.lt.f32.partialorder %v113_v41, inf  ;;  %v137_v1 = vmul.f32 %v113_v41, %v113_v41 }
  0x80   :  { %v171_v31 = vpop.permute.xlu1 %170  ;;  %vm48_vm9 = vcmp.lt.f32.partialorder %v40_v42, inf  ;;  %vm454_vm12 = vmand %vm416_vm2, %vm121_vm7  ;;  %v64_v3 = vmul.f32 %v40_v42, %v40_v42 }
  0x81   :  { %v169_v32 = vpop.permute.xlu0 %168  ;;  %v185_v46 = vsub.f32 %v246_v6, %v171_v31  ;;  %vm462_vm14 = vmand %vm416_vm2, %vm48_vm9  ;;  %v145_v29 = vsel %vm454_vm12, %v137_v1, 0.0 }
  0x82   :  { %v184_v50 = vsub.f32 %v298_v7, %v169_v32  ;;  %v72_v30 = vsel %vm462_vm14, %v64_v3, 0.0  ;;  %v152_v41 = vadd.f32 %v151_v26, %v145_v29 }
  0x83   :  { %vm193_vm11 = vcmp.lt.f32.partialorder %v185_v46, inf  ;;  %v209_v6 = vmul.f32 %v185_v46, %v185_v46 }
  0x84   :  { %v102_v36 = vpop.permute.xlu1 %101  ;;  %vm192_vm13 = vcmp.lt.f32.partialorder %v184_v50, inf  ;;  %vm469_vm0 = vmand %vm416_vm2, %vm193_vm11  ;;  %v208_v7 = vmul.f32 %v184_v50, %v184_v50 }
  0x85   :  { %v29_v37 = vpop.permute.xlu0 %28  ;;  %v114_v52 = vsub.f32 %v306_v8, %v102_v36  ;;  %vm481_vm3 = vmand %vm416_vm2, %vm192_vm13  ;;  %v217_v33 = vsel %vm469_vm0, %v209_v6, 0.0 }
  0x86   :  { %v41_v54 = vsub.f32 %v311_v9, %v29_v37 }
  0x87   :  { %vm122_vm15 = vcmp.lt.f32.partialorder %v114_v52, inf  ;;  %v138_v27 = vmul.f32 %v114_v52, %v114_v52 }
  0x88   :  { %v31_v43 = vpop.permute.xlu1 %30  ;;  %vm49_vm1 = vcmp.lt.f32.partialorder %v41_v54, inf  ;;  %vm489_vm5 = vmand %vm416_vm2, %vm122_vm15  ;;  %v65_v31 = vmul.f32 %v41_v54, %v41_v54 }
  0x89   :  { %v173_v44 = vpop.permute.xlu0 %172  ;;  %v42_v60 = vsub.f32 %v320_v10, %v31_v43  ;;  %vm501_vm7 = vmand %vm416_vm2, %vm49_vm1  ;;  %v146_v43 = vsel %vm489_vm5, %v138_v27, 0.0 }
  0x8a   :  { %v186_v0 = vsub.f32 %v325_v11, %v173_v44  ;;  %v70_v11 = vsel %vm436_vm8, %v62_v57, 0.0  ;;  %v73_v46 = vsel %vm501_vm7, %v65_v31, 0.0  ;;  %v153_v59 = vadd.f32 %v152_v41, %v146_v43 }
  0x8b   :  { %vm50_vm4 = vcmp.lt.f32.partialorder %v42_v60, inf  ;;  %v78_v32 = vadd.f32 %v71_v24, %v70_v11  ;;  %v66_v37 = vmul.f32 %v42_v60, %v42_v60 }
  0x8c   :  { %v175_v55 = vpop.permute.xlu1 %174  ;;  %vm194_vm6 = vcmp.lt.f32.partialorder %v186_v0, inf  ;;  %vm512_vm9 = vmand %vm416_vm2, %vm50_vm4  ;;  %v210_v47 = vmul.f32 %v186_v0, %v186_v0 }
  0x8d   :  { %v104_v56 = vpop.permute.xlu0 %103  ;;  %v187_v4 = vsub.f32 %v334_v12, %v175_v55  ;;  %vm519_vm11 = vmand %vm416_vm2, %vm194_vm6  ;;  %v79_v42 = vadd.f32 %v78_v32, %v72_v30  ;;  %v74_v54 = vsel %vm512_vm9, %v66_v37, 0.0 }
  0x8e   :  { %v115_v8 = vsub.f32 %v339_v13, %v104_v56  ;;  %v218_v0 = vsel %vm519_vm11, %v210_v47, 0.0 }
  0x8f   :  { %vm195_vm8 = vcmp.lt.f32.partialorder %v187_v4, inf  ;;  %v211_v49 = vmul.f32 %v187_v4, %v187_v4  ;;  %v80_v60 = vadd.f32 %v79_v42, %v73_v46 }
  0x90   :  { %v106_v9 = vpop.permute.xlu1 %105  ;;  %vm123_vm10 = vcmp.lt.f32.partialorder %v115_v8, inf  ;;  %vm530_vm13 = vmand %vm416_vm2, %vm195_vm8 }
  0x91   :  { %v33_v10 = vpop.permute.xlu0 %32  ;;  %v116_v25 = vsub.f32 %v348_v14, %v106_v9  ;;  %vm539_vm15 = vmand %vm416_vm2, %vm123_vm10  ;;  %v219_v2 = vsel %vm530_vm13, %v211_v49, 0.0 }
  0x92   :  { %v43_v28 = vsub.f32 %v353_v15, %v33_v10  ;;  %v216_v15 = vsel %vm481_vm3, %v208_v7, 0.0 }
  0x93   :  { %vm124_vm12 = vcmp.lt.f32.partialorder %v116_v25, inf  ;;  %v224_v48 = vadd.f32 %v217_v33, %v216_v15  ;;  %v140_v51 = vmul.f32 %v116_v25, %v116_v25 }
  0x94   :  { %v35_v35 = vpop.permute.xlu1 %34  ;;  %vm51_vm14 = vcmp.lt.f32.partialorder %v43_v28, inf  ;;  %vm546_vm1 = vmand %vm416_vm2, %vm124_vm12  ;;  %v67_v56 = vmul.f32 %v43_v28, %v43_v28 }
  0x95   :  { %v177_v36 = vpop.permute.xlu0 %176  ;;  %v44_v39 = vsub.f32 %v362_v16, %v35_v35  ;;  %vm554_vm4 = vmand %vm416_vm2, %vm51_vm14  ;;  %v148_v3 = vsel %vm546_vm1, %v140_v51, 0.0  ;;  %v225_v24 = vadd.f32 %v224_v48, %v218_v0 }
  0x96   :  { %v188_v40 = vsub.f32 %v367_v17, %v177_v36  ;;  %v139_v17 = vmul.f32 %v115_v8, %v115_v8  ;;  %v75_v7 = vsel %vm554_vm4, %v67_v56, 0.0 }
  0x97   :  { %vm52_vm0 = vcmp.lt.f32.partialorder %v44_v39, inf  ;;  %v68_v62 = vmul.f32 %v44_v39, %v44_v39  ;;  %v226_v27 = vadd.f32 %v225_v24, %v219_v2 }
  0x98   :  { %vm196_vm3 = vcmp.lt.f32.partialorder %v188_v40, inf  ;;  %v179_v52 = vpop.permute.xlu1 %178  ;;  %vm563_vm5 = vmand %vm416_vm2, %vm52_vm0  ;;  %v212_v63 = vmul.f32 %v188_v40, %v188_v40  ;;  %v147_v1 = vsel %vm539_vm15, %v139_v17, 0.0 }
  0x99   :  { %v108_v53 = vpop.permute.xlu0 %107  ;;  %v189_v57 = vsub.f32 %v376_v18, %v179_v52  ;;  %vm574_vm6 = vmand %vm416_vm2, %vm196_vm3  ;;  %v154_v12 = vadd.f32 %v153_v59, %v147_v1  ;;  %v76_v25 = vsel %vm563_vm5, %v68_v62, 0.0 }
  0x9a   :  { %v117_v58 = vsub.f32 %v381_v19, %v108_v53  ;;  %v81_v19 = vadd.f32 %v80_v60, %v74_v54  ;;  %v220_v26 = vsel %vm574_vm6, %v212_v63, 0.0 }
  0x9b   :  { %vm197_vm7 = vcmp.lt.f32.partialorder %v189_v57, inf  ;;  %v213_v8 = vmul.f32 %v189_v57, %v189_v57  ;;  %v155_v28 = vadd.f32 %v154_v12, %v148_v3  ;;  %v227_v37 = vadd.f32 %v226_v27, %v220_v26 }
  0x9c   :  { %vm125_vm8 = vcmp.lt.f32.partialorder %v117_v58, inf  ;;  %v141_v4 = vmul.f32 %v117_v58, %v117_v58  ;;  %v110_v5 = vpop.permute.xlu1 %109  ;;  %vm599_vm10 = vmand %vm416_vm2, %vm197_vm7  ;;  %v82_v29 = vadd.f32 %v81_v19, %v75_v7 }
  0x9d   :  { %v37_v6 = vpop.permute.xlu0 %36  ;;  %vm586_vm9 = vmand %vm416_vm2, %vm125_vm8  ;;  %v118_v10 = vsub.f32 %v390_v20, %v110_v5  ;;  %v221_v33 = vsel %vm599_vm10, %v213_v8, 0.0 }
  0x9e   :  { %v45_v11 = vsub.f32 %v395_v21, %v37_v6  ;;  %v149_v20 = vsel %vm586_vm9, %v141_v4, 0.0  ;;  %v83_v36 = vadd.f32 %v82_v29, %v76_v25  ;;  %v228_v41 = vadd.f32 %v227_v37, %v221_v33 }
  0x9f   :  { %vm126_vm11 = vcmp.lt.f32.partialorder %v118_v10, inf  ;;  %v142_v21 = vmul.f32 %v118_v10, %v118_v10  ;;  %v156_v38 = vadd.f32 %v155_v28, %v149_v20 }
  0xa0   :  { %vm53_vm12 = vcmp.lt.f32.partialorder %v45_v11, inf  ;;  %vm607_vm13 = vmand %vm416_vm2, %vm126_vm11  ;;  %v69_v14 = vmul.f32 %v45_v11, %v45_v11  ;;  %v183_v32 = vpop.permute.xlu1 %182 }
  0xa1   :  { %v181_v31 = vpop.permute.xlu0 %180  ;;  %v150_v15 = vsel %vm607_vm13, %v142_v21, 0.0  ;;  %vm61_vm14 = vmand %vm416_vm2, %vm53_vm12  ;;  %v191_v35 = vsub.f32 %v409_v23, %v183_v32 }
  0xa2   :  { %v190_v34 = vsub.f32 %v404_v22, %v181_v31  ;;  %v77_v39 = vsel %vm61_vm14, %v69_v14, 0.0  ;;  %v157_v42 = vadd.f32 %v156_v38, %v150_v15 }
  0xa3   :  { %vm199_vm0 = vcmp.lt.f32.partialorder %v191_v35, inf  ;;  %v84_v43 = vadd.f32 %v83_v36, %v77_v39  ;;  %v215_v44 = vmul.f32 %v191_v35, %v191_v35 }
  0xa4   :  { %vm198_vm15 = vcmp.lt.f32.partialorder %v190_v34, inf  ;;  %v214_v40 = vmul.f32 %v190_v34, %v190_v34  ;;  %vm207_vm3 = vmand %vm416_vm2, %vm199_vm0 }
  0xa5   :  { %vm206_vm1 = vmand %vm416_vm2, %vm198_vm15  ;;  %v223_v23 = vsel %vm207_vm3, %v215_v44, 0.0  ;;  %v158_v47 = vadd.f32 %v157_v42, %v84_v43 }
  0xa6   :  { %v222_v46 = vsel %vm206_vm1, %v214_v40, 0.0 }
  0xa7   :  { %v229_v22 = vadd.f32 %v228_v41, %v222_v46 }
  0xa9   :  { %v230_v16 = vadd.f32 %v229_v22, %v223_v23 }
  0xab   :  { %v231_v17 = vadd.f32 %v230_v16, %v158_v47 }
  0xad   :  { %232 = vst [vmem:[%s627_s1] sm:$0xff] %v231_v17 }

</bundles_post_ra>
